<compile_context>
chip_gen: v6e
topology: v6e:2x2x1
jax: 0.10.0
libtpu: 0.0.40
codegen_flags: <defaults>
</compile_context>

<pallas_src>
import numpy as np
import jax
import jax.numpy as jnp
from jax.experimental import pallas as pl
from jax.experimental.pallas import tpu as pltpu


# ---------------------------------------------------------------------------
# Pallas kernel: BT samples per grid step, fully fused forward.
# ---------------------------------------------------------------------------
def _value_model_kernel(x_ref, spans_ref, a_ref,
                        w1_ref, b1_ref, w2_ref, b2_ref, w3_ref, b3_ref,
                        wh_ref, bht_ref,
                        logits_ref, hidden_ref):
    BT, S, D = x_ref.shape
    L = spans_ref.shape[1]
    H = w1_ref.shape[1]

    x = x_ref[...]                                       # (BT, S, D) bf16
    sp = spans_ref[...]                                  # (BT, L, 2) int32

    # --- integrate(): inclusive span-sum per (sample, label) via one masked matmul ---
    col = jax.lax.broadcasted_iota(jnp.int32, (BT, L, S), 2)
    starts = sp[:, :, 0:1]                               # (BT, L, 1)
    ends = sp[:, :, 1:2]                                 # (BT, L, 1)
    mask = ((col >= starts) & (col <= ends)).astype(jnp.float32).astype(jnp.bfloat16)
    xi = jnp.einsum("bls,bsd->bld", mask, x,
                    preferred_element_type=jnp.float32)  # (BT, L, D) f32
    h = xi.reshape(BT * L, D)                            # free: merge leading dims

    # --- 3x GCNConv: relu(A_norm @ (X @ W) + b); batch handled via block-diagonal A ---
    # TODO(synk): dropout1/2/3 are identity here (inference / deterministic mode).
    a = a_ref[...]                                       # (BT*L, BT*L) bf16

    def gcn(h2d, w_ref, b_ref):
        hw = jnp.dot(h2d.astype(jnp.bfloat16), w_ref[...],
                     preferred_element_type=jnp.float32)             # (BT*L, H) f32
        ah = jnp.dot(a, hw.astype(jnp.bfloat16),
                     preferred_element_type=jnp.float32)             # (BT*L, H) f32
        return jnp.maximum(ah + b_ref[...], 0.0)

    h = gcn(h, w1_ref, b1_ref)
    h = gcn(h, w2_ref, b2_ref)
    h = gcn(h, w3_ref, b3_ref)
    h3 = h.reshape(BT, L, H)                             # free: split leading dim

    # --- hidden: single dense full-block store ---
    hidden_ref[...] = h3

    # --- per-label heads: logits[b, c, l] = <h3[b, l, :], wh[c, l, :]> + bh[l, c] ---
    wh = wh_ref[...]                                     # (2, L, H) f32
    bht = bht_ref[...]                                   # (2, L)    f32
    l0 = jnp.sum(h3 * wh[0][None], axis=-1) + bht[0:1, :]            # (BT, L)
    l1 = jnp.sum(h3 * wh[1][None], axis=-1) + bht[1:2, :]            # (BT, L)
    logits_ref[:, 0:1, :] = l0[:, None, :]
    logits_ref[:, 1:2, :] = l1[:, None, :]


# ---------------------------------------------------------------------------
# GCN symmetric normalization: D^{-1/2} (A + I) D^{-1/2}.
# ---------------------------------------------------------------------------
def gcn_norm_adj(edge_index, num_nodes):
    a = jnp.zeros((num_nodes, num_nodes), jnp.float32)
    a = a.at[edge_index[0], edge_index[1]].set(1.0)
    a = a + jnp.eye(num_nodes, dtype=jnp.float32)
    dinv = jax.lax.rsqrt(a.sum(axis=1))
    return a * dinv[:, None] * dinv[None, :]


def _choose_block_batch(B, L, S, D):
    # Target BT*L >= 128 rows for the MXU M dimension, but keep the double-buffered
    # bf16 x block under ~24 MiB so it also fits v7x's smaller (64 MiB) VMEM.
    bt = max(1, -(-128 // L))
    budget = 24 * 1024 * 1024
    while bt > 1 and 2 * bt * S * D * 2 > budget:
        bt //= 2
    return max(1, min(bt, B))


def _vmem_limit_bytes(BT, S, D, H, L):
    blk_in = BT * S * D * 2 + BT * L * 2 * 4
    blk_out = BT * (2 * L + L * H) * 4
    weights = ((BT * L) ** 2 + D * H + 2 * H * H) * 2 + (3 * H + 2 * L * H + 2 * L) * 4
    interm = BT * L * S * 2 + BT * L * D * 4 + 5 * BT * L * H * 4
    est = 2 * (blk_in + blk_out + weights) + interm + (8 << 20)
    return int(min(max(est, 16 << 20), 60 << 20))


# ---------------------------------------------------------------------------
# Wrapper: mirrors ValueModel.forward(data, edge_index, edge_attr, spans).
# ---------------------------------------------------------------------------
def value_model_forward(params, input_ids, attention_mask, edge_index, spans,
                        edge_attr=None, block_batch=None):
    del attention_mask, edge_attr
    B, S = input_ids.shape
    # TODO(synk): the DeBERTa transformer backbone has no clean Pallas equivalent here;
    # it is stubbed as a deterministic embedding lookup producing last_hidden_state.
    x = params["embedding"][input_ids].astype(jnp.float32)         # (B, S, D)

    L = params["bh"].shape[0]
    D = x.shape[-1]
    H = params["w1"].shape[1]

    BT = block_batch or _choose_block_batch(B, L, S, D)
    G = -(-B // BT)
    B_pad = G * BT
    spans = spans.astype(jnp.int32)
    if B_pad != B:
        x = jnp.pad(x, ((0, B_pad - B), (0, 0), (0, 0)))
        spans = jnp.pad(spans, ((0, B_pad - B), (0, 0), (0, 0)))

    # bf16 for the streamed activations + matmul weights (f32 accumulation in-kernel).
    x_bf16 = x.astype(jnp.bfloat16)
    a_norm = gcn_norm_adj(edge_index, L)
    # Block-diagonal adjacency applies the shared (L, L) A to each of the BT samples
    # stacked into the (BT*L, H) activation matrix, with no in-kernel transposes.
    a_block = jnp.kron(jnp.eye(BT, dtype=jnp.float32), a_norm).astype(jnp.bfloat16)
    w1 = params["w1"].astype(jnp.bfloat16)
    w2 = params["w2"].astype(jnp.bfloat16)
    w3 = params["w3"].astype(jnp.bfloat16)
    bht = params["bh"].T                                            # (2, L)

    flops = int(2 * B_pad * L * (S * D + D * H + 2 * H * H + 3 * BT * L * H + 2 * H))
    bytes_accessed = int(
        B_pad * S * D * 2 + B_pad * L * 2 * 4 + B_pad * (2 * L + L * H) * 4
        + ((BT * L) ** 2 + D * H + 2 * H * H) * 2
        + (3 * H + 2 * L * H + 2 * L) * 4)
    cost = pl.CostEstimate(flops=flops, transcendentals=0,
                           bytes_accessed=bytes_accessed)

    logits_t, hidden3 = pl.pallas_call(
        _value_model_kernel,
        grid=(G,),
        in_specs=[
            pl.BlockSpec((BT, S, D), lambda i: (i, 0, 0)),          # x (bf16)
            pl.BlockSpec((BT, L, 2), lambda i: (i, 0, 0)),          # spans (int32)
            pl.BlockSpec((BT * L, BT * L), lambda i: (0, 0)),       # block-diag A_norm
            pl.BlockSpec((D, H), lambda i: (0, 0)),                 # W1
            pl.BlockSpec((1, H), lambda i: (0, 0)),                 # b1
            pl.BlockSpec((H, H), lambda i: (0, 0)),                 # W2
            pl.BlockSpec((1, H), lambda i: (0, 0)),                 # b2
            pl.BlockSpec((H, H), lambda i: (0, 0)),                 # W3
            pl.BlockSpec((1, H), lambda i: (0, 0)),                 # b3
            pl.BlockSpec((2, L, H), lambda i: (0, 0, 0)),           # head weights (2, L, H)
            pl.BlockSpec((2, L), lambda i: (0, 0)),                 # head biases  (2, L)
        ],
        out_specs=(
            pl.BlockSpec((BT, 2, L), lambda i: (i, 0, 0)),          # logits  (B, 2, L)
            pl.BlockSpec((BT, L, H), lambda i: (i, 0, 0)),          # hidden  (B, L, H)
        ),
        out_shape=(jax.ShapeDtypeStruct((B_pad, 2, L), jnp.float32),
                   jax.ShapeDtypeStruct((B_pad, L, H), jnp.float32)),
        compiler_params=pltpu.CompilerParams(
            dimension_semantics=("parallel",),
            vmem_limit_bytes=_vmem_limit_bytes(BT, S, D, H, L)),
        cost_estimate=cost,
    )(x_bf16, spans, a_block, w1, params["b1"], w2, params["b2"],
      w3, params["b3"], params["wh"], bht)

    out_logits = jnp.transpose(logits_t[:B], (0, 2, 1))             # (B, L, 2)
    hidden_flat = hidden3[:B].reshape(B, L * H)                     # (B, L*H)
    out_list = [out_logits[:, l, :] for l in range(L)]
    # Matches: (out_logits, hidden.view(batch_size, -1), out_list, None)
    return out_logits, hidden_flat, out_list, None


# ---------------------------------------------------------------------------
# Pure-JAX reference with the same bf16-input / f32-accumulate recipe.
# ---------------------------------------------------------------------------
def _ref_forward(params, input_ids, edge_index, spans):
    x = params["embedding"][input_ids].astype(jnp.bfloat16)         # (B, S, D)
    B, S, D = x.shape
    L = params["bh"].shape[0]
    a = gcn_norm_adj(edge_index, L).astype(jnp.bfloat16)
    col = jnp.arange(S)[None, None, :]
    m = ((col >= spans[:, :, 0:1]) & (col <= spans[:, :, 1:2])).astype(jnp.bfloat16)
    xi = jnp.einsum("bls,bsd->bld", m, x, preferred_element_type=jnp.float32)

    def gcn(h, w, b):
        hw = jnp.einsum("bld,dh->blh", h.astype(jnp.bfloat16),
                        w.astype(jnp.bfloat16), preferred_element_type=jnp.float32)
        ah = jnp.einsum("mn,bnh->bmh", a, hw.astype(jnp.bfloat16),
                        preferred_element_type=jnp.float32)
        return jnp.maximum(ah + b, 0.0)

    h = gcn(xi, params["w1"], params["b1"])
    h = gcn(h, params["w2"], params["b2"])
    h = gcn(h, params["w3"], params["b3"])
    l0 = jnp.sum(h * params["wh"][0][None], axis=-1)
    l1 = jnp.sum(h * params["wh"][1][None], axis=-1)
    logits = jnp.stack([l0, l1], axis=-1) + params["bh"][None]
    return logits, h.reshape(B, -1)


if __name__ == "__main__":
    # Small deterministic config consistent with the module's forward.
    B, S, D, H, L, VOCAB = 2, 16, 32, 32, 8, 50

    key = jax.random.PRNGKey(0)
    keys = jax.random.split(key, 10)

    params = {
        "embedding": 0.1 * jax.random.normal(keys[0], (VOCAB, D), jnp.float32),
        "w1": 0.1 * jax.random.normal(keys[1], (D, H), jnp.float32),
        "b1": 0.1 * jax.random.normal(keys[2], (1, H), jnp.float32),
        "w2": 0.1 * jax.random.normal(keys[3], (H, H), jnp.float32),
        "b2": 0.1 * jax.random.normal(keys[4], (1, H), jnp.float32),
        "w3": 0.1 * jax.random.normal(keys[5], (H, H), jnp.float32),
        "b3": 0.1 * jax.random.normal(keys[6], (1, H), jnp.float32),
        # per-label nn.Linear(H, 2): weights (2, H) each, packed as (2, L, H)
        "wh": 0.1 * jax.random.normal(keys[7], (2, L, H), jnp.float32),
        "bh": 0.1 * jax.random.normal(keys[8], (L, 2), jnp.float32),
    }

    input_ids = jax.random.randint(keys[9], (B, S), 0, VOCAB, dtype=jnp.int32)
    attention_mask = jnp.ones((B, S), jnp.int32)

    # Deterministic token spans per (batch, label): [start, end] inclusive.
    spans_np = np.zeros((B, L, 2), np.int32)
    for b in range(B):
        for l in range(L):
            start = (3 * l + b) % (S - 3)
            spans_np[b, l] = [start, start + 2]
    spans = jnp.asarray(spans_np)

    # Ring graph over the L label nodes (both directions).
    src = np.concatenate([np.arange(L), (np.arange(L) + 1) % L])
    dst = np.concatenate([(np.arange(L) + 1) % L, np.arange(L)])
    edge_index = jnp.asarray(np.stack([src, dst]).astype(np.int32))
    edge_attr = None  # unused by the forward (matches the reference module)

    data = {"input_ids": input_ids, "attention_mask": attention_mask}
    out_logits, hidden_flat, out_list, _ = value_model_forward(
        params, data["input_ids"], data["attention_mask"], edge_index, spans,
        edge_attr=edge_attr)
    jax.block_until_ready(out_logits)
    jax.block_until_ready(hidden_flat)

    ref_logits, ref_hidden = _ref_forward(params, input_ids, edge_index, spans)
    assert out_logits.shape == (B, L, 2)
    assert hidden_flat.shape == (B, L * H)
    assert len(out_list) == L and out_list[0].shape == (B, 2)
    assert np.allclose(np.asarray(out_logits), np.asarray(ref_logits),
                       rtol=2e-3, atol=2e-3)
    assert np.allclose(np.asarray(hidden_flat), np.asarray(ref_hidden),
                       rtol=2e-3, atol=2e-3)

    print("KERNEL_OK")
</pallas_src>

<mosaic_0001>
module attributes {stable_mosaic.version = 11 : i64} {
  func.func @_value_model_kernel(%arg0: i32, %arg1: memref<2x16x32xbf16, #tpu.memory_space<vmem>>, %arg2: memref<2x8x2xi32, #tpu.memory_space<vmem>>, %arg3: memref<16x16xbf16, #tpu.memory_space<vmem>>, %arg4: memref<32x32xbf16, #tpu.memory_space<vmem>>, %arg5: memref<1x32xf32, #tpu.memory_space<vmem>>, %arg6: memref<32x32xbf16, #tpu.memory_space<vmem>>, %arg7: memref<1x32xf32, #tpu.memory_space<vmem>>, %arg8: memref<32x32xbf16, #tpu.memory_space<vmem>>, %arg9: memref<1x32xf32, #tpu.memory_space<vmem>>, %arg10: memref<2x8x32xf32, #tpu.memory_space<vmem>>, %arg11: memref<2x8xf32, #tpu.memory_space<vmem>>, %arg12: memref<2x2x8xf32, #tpu.memory_space<vmem>>, %arg13: memref<2x8x32xf32, #tpu.memory_space<vmem>>) attributes {dimension_semantics = [#tpu.dimension_semantics<parallel>], iteration_bounds = array<i64: 1>, scalar_prefetch = 0 : i64, scratch_operands = 0 : i64, tpu.core_type = #tpu.core_type<tc>, window_params = [{transform_indices = @transform_0, window_bounds = array<i64: 2, 16, 32>}, {transform_indices = @transform_1, window_bounds = array<i64: 2, 8, 2>}, {pipeline_mode = #tpu.pipeline_mode<synchronous>, transform_indices = @transform_2, window_bounds = array<i64: 16, 16>}, {pipeline_mode = #tpu.pipeline_mode<synchronous>, transform_indices = @transform_3, window_bounds = array<i64: 32, 32>}, {pipeline_mode = #tpu.pipeline_mode<synchronous>, transform_indices = @transform_4, window_bounds = array<i64: 1, 32>}, {pipeline_mode = #tpu.pipeline_mode<synchronous>, transform_indices = @transform_5, window_bounds = array<i64: 32, 32>}, {pipeline_mode = #tpu.pipeline_mode<synchronous>, transform_indices = @transform_6, window_bounds = array<i64: 1, 32>}, {pipeline_mode = #tpu.pipeline_mode<synchronous>, transform_indices = @transform_7, window_bounds = array<i64: 32, 32>}, {pipeline_mode = #tpu.pipeline_mode<synchronous>, transform_indices = @transform_8, window_bounds = array<i64: 1, 32>}, {pipeline_mode = #tpu.pipeline_mode<synchronous>, transform_indices = @transform_9, window_bounds = array<i64: 2, 8, 32>}, {pipeline_mode = #tpu.pipeline_mode<synchronous>, transform_indices = @transform_10, window_bounds = array<i64: 2, 8>}, {transform_indices = @transform_11, window_bounds = array<i64: 2, 2, 8>}, {transform_indices = @transform_12, window_bounds = array<i64: 2, 8, 32>}]} {
    %c0 = arith.constant 0 : index
    %c0_0 = arith.constant 0 : index
    %c0_1 = arith.constant 0 : index
    %0 = vector.load %arg1[%c0, %c0_0, %c0_1] : memref<2x16x32xbf16, #tpu.memory_space<vmem>>, vector<2x16x32xbf16>
    %c0_2 = arith.constant 0 : index
    %c0_3 = arith.constant 0 : index
    %c0_4 = arith.constant 0 : index
    %1 = vector.load %arg2[%c0_2, %c0_3, %c0_4] : memref<2x8x2xi32, #tpu.memory_space<vmem>>, vector<2x8x2xi32>
    %2 = tpu.iota {dimensions = array<i32: 2>} : vector<2x8x16xi32>
    %3 = vector.extract_strided_slice %1 {offsets = [0, 0, 0], sizes = [2, 8, 1], strides = [1, 1, 1]} : vector<2x8x2xi32> to vector<2x8x1xi32>
    %4 = vector.extract_strided_slice %1 {offsets = [0, 0, 1], sizes = [2, 8, 1], strides = [1, 1, 1]} : vector<2x8x2xi32> to vector<2x8x1xi32>
    %5 = vector.broadcast %3 : vector<2x8x1xi32> to vector<2x8x16xi32>
    %6 = arith.cmpi sge, %2, %5 : vector<2x8x16xi32>
    %7 = vector.broadcast %4 : vector<2x8x1xi32> to vector<2x8x16xi32>
    %8 = arith.cmpi sle, %2, %7 : vector<2x8x16xi32>
    %9 = arith.andi %6, %8 : vector<2x8x16xi1>
    %10 = arith.extui %9 : vector<2x8x16xi1> to vector<2x8x16xi32>
    %11 = arith.sitofp %10 : vector<2x8x16xi32> to vector<2x8x16xf32>
    %12 = arith.truncf %11 : vector<2x8x16xf32> to vector<2x8x16xbf16>
    "tpu.trace_start"() <{level = 10 : i32, message = "bls,bsd->bld"}> : () -> ()
    %cst = arith.constant dense<0.000000e+00> : vector<2x8x32xf32>
    %13 = tpu.matmul %12, %0, %cst {dimension_numbers = #tpu.dot_dimension_numbers<[2], [1], [1], [2], [0, 0, 0, 1, 1, 2], [0], [0]>} : vector<2x8x16xbf16>, vector<2x16x32xbf16>, vector<2x8x32xf32> -> vector<2x8x32xf32>
    "tpu.trace_stop"() : () -> ()
    %14 = vector.shape_cast %13 : vector<2x8x32xf32> to vector<16x32xf32>
    %c0_5 = arith.constant 0 : index
    %c0_6 = arith.constant 0 : index
    %15 = vector.load %arg3[%c0_5, %c0_6] : memref<16x16xbf16, #tpu.memory_space<vmem>>, vector<16x16xbf16>
    %16 = arith.truncf %14 : vector<16x32xf32> to vector<16x32xbf16>
    %c0_7 = arith.constant 0 : index
    %c0_8 = arith.constant 0 : index
    %17 = vector.load %arg4[%c0_7, %c0_8] : memref<32x32xbf16, #tpu.memory_space<vmem>>, vector<32x32xbf16>
    %cst_9 = arith.constant dense<0.000000e+00> : vector<16x32xf32>
    %18 = tpu.matmul %16, %17, %cst_9 {dimension_numbers = #tpu.dot_dimension_numbers<[1], [0], [0], [1], [0, 0, 1, 1], [], []>} : vector<16x32xbf16>, vector<32x32xbf16>, vector<16x32xf32> -> vector<16x32xf32>
    %19 = arith.truncf %18 : vector<16x32xf32> to vector<16x32xbf16>
    %cst_10 = arith.constant dense<0.000000e+00> : vector<16x32xf32>
    %20 = tpu.matmul %15, %19, %cst_10 {dimension_numbers = #tpu.dot_dimension_numbers<[1], [0], [0], [1], [0, 0, 1, 1], [], []>} : vector<16x16xbf16>, vector<16x32xbf16>, vector<16x32xf32> -> vector<16x32xf32>
    %c0_11 = arith.constant 0 : index
    %c0_12 = arith.constant 0 : index
    %21 = vector.load %arg5[%c0_11, %c0_12] : memref<1x32xf32, #tpu.memory_space<vmem>>, vector<1x32xf32>
    %22 = vector.broadcast %21 : vector<1x32xf32> to vector<16x32xf32>
    %23 = arith.addf %20, %22 : vector<16x32xf32>
    %cst_13 = arith.constant 0.000000e+00 : f32
    %24 = vector.broadcast %cst_13 : f32 to vector<16x32xf32>
    %25 = arith.maximumf %23, %24 : vector<16x32xf32>
    %26 = arith.truncf %25 : vector<16x32xf32> to vector<16x32xbf16>
    %c0_14 = arith.constant 0 : index
    %c0_15 = arith.constant 0 : index
    %27 = vector.load %arg6[%c0_14, %c0_15] : memref<32x32xbf16, #tpu.memory_space<vmem>>, vector<32x32xbf16>
    %cst_16 = arith.constant dense<0.000000e+00> : vector<16x32xf32>
    %28 = tpu.matmul %26, %27, %cst_16 {dimension_numbers = #tpu.dot_dimension_numbers<[1], [0], [0], [1], [0, 0, 1, 1], [], []>} : vector<16x32xbf16>, vector<32x32xbf16>, vector<16x32xf32> -> vector<16x32xf32>
    %29 = arith.truncf %28 : vector<16x32xf32> to vector<16x32xbf16>
    %cst_17 = arith.constant dense<0.000000e+00> : vector<16x32xf32>
    %30 = tpu.matmul %15, %29, %cst_17 {dimension_numbers = #tpu.dot_dimension_numbers<[1], [0], [0], [1], [0, 0, 1, 1], [], []>} : vector<16x16xbf16>, vector<16x32xbf16>, vector<16x32xf32> -> vector<16x32xf32>
    %c0_18 = arith.constant 0 : index
    %c0_19 = arith.constant 0 : index
    %31 = vector.load %arg7[%c0_18, %c0_19] : memref<1x32xf32, #tpu.memory_space<vmem>>, vector<1x32xf32>
    %32 = vector.broadcast %31 : vector<1x32xf32> to vector<16x32xf32>
    %33 = arith.addf %30, %32 : vector<16x32xf32>
    %cst_20 = arith.constant 0.000000e+00 : f32
    %34 = vector.broadcast %cst_20 : f32 to vector<16x32xf32>
    %35 = arith.maximumf %33, %34 : vector<16x32xf32>
    %36 = arith.truncf %35 : vector<16x32xf32> to vector<16x32xbf16>
    %c0_21 = arith.constant 0 : index
    %c0_22 = arith.constant 0 : index
    %37 = vector.load %arg8[%c0_21, %c0_22] : memref<32x32xbf16, #tpu.memory_space<vmem>>, vector<32x32xbf16>
    %cst_23 = arith.constant dense<0.000000e+00> : vector<16x32xf32>
    %38 = tpu.matmul %36, %37, %cst_23 {dimension_numbers = #tpu.dot_dimension_numbers<[1], [0], [0], [1], [0, 0, 1, 1], [], []>} : vector<16x32xbf16>, vector<32x32xbf16>, vector<16x32xf32> -> vector<16x32xf32>
    %39 = arith.truncf %38 : vector<16x32xf32> to vector<16x32xbf16>
    %cst_24 = arith.constant dense<0.000000e+00> : vector<16x32xf32>
    %40 = tpu.matmul %15, %39, %cst_24 {dimension_numbers = #tpu.dot_dimension_numbers<[1], [0], [0], [1], [0, 0, 1, 1], [], []>} : vector<16x16xbf16>, vector<16x32xbf16>, vector<16x32xf32> -> vector<16x32xf32>
    %c0_25 = arith.constant 0 : index
    %c0_26 = arith.constant 0 : index
    %41 = vector.load %arg9[%c0_25, %c0_26] : memref<1x32xf32, #tpu.memory_space<vmem>>, vector<1x32xf32>
    %42 = vector.broadcast %41 : vector<1x32xf32> to vector<16x32xf32>
    %43 = arith.addf %40, %42 : vector<16x32xf32>
    %cst_27 = arith.constant 0.000000e+00 : f32
    %44 = vector.broadcast %cst_27 : f32 to vector<16x32xf32>
    %45 = arith.maximumf %43, %44 : vector<16x32xf32>
    %46 = vector.shape_cast %45 : vector<16x32xf32> to vector<2x8x32xf32>
    %c0_28 = arith.constant 0 : index
    %c0_29 = arith.constant 0 : index
    %c0_30 = arith.constant 0 : index
    %47 = vector.load %arg13[%c0_28, %c0_29, %c0_30] : memref<2x8x32xf32, #tpu.memory_space<vmem>>, vector<2x8x32xf32>
    tpu.vector_store %arg13[%c0_28, %c0_29, %c0_30], %46 {strides = array<i32>} : memref<2x8x32xf32, #tpu.memory_space<vmem>>, vector<2x8x32xf32>,
    %c0_31 = arith.constant 0 : index
    %c0_32 = arith.constant 0 : index
    %c0_33 = arith.constant 0 : index
    %48 = vector.load %arg10[%c0_31, %c0_32, %c0_33] : memref<2x8x32xf32, #tpu.memory_space<vmem>>, vector<2x8x32xf32>
    %c0_34 = arith.constant 0 : index
    %c0_35 = arith.constant 0 : index
    %49 = vector.load %arg11[%c0_34, %c0_35] : memref<2x8xf32, #tpu.memory_space<vmem>>, vector<2x8xf32>
    %50 = vector.extract_strided_slice %48 {offsets = [0, 0, 0], sizes = [1, 8, 32], strides = [1, 1, 1]} : vector<2x8x32xf32> to vector<1x8x32xf32>
    %51 = vector.shape_cast %50 : vector<1x8x32xf32> to vector<8x32xf32>
    %52 = vector.shape_cast %51 : vector<8x32xf32> to vector<1x8x32xf32>
    %53 = vector.broadcast %52 : vector<1x8x32xf32> to vector<2x8x32xf32>
    %54 = arith.mulf %46, %53 : vector<2x8x32xf32>
    %cst_36 = arith.constant dense<0.000000e+00> : vector<2x8xf32>
    %55 = vector.multi_reduction <add>, %54, %cst_36 [2] : vector<2x8x32xf32> to vector<2x8xf32>
    %56 = vector.extract_strided_slice %49 {offsets = [0, 0], sizes = [1, 8], strides = [1, 1]} : vector<2x8xf32> to vector<1x8xf32>
    %57 = vector.broadcast %56 : vector<1x8xf32> to vector<2x8xf32>
    %58 = arith.addf %55, %57 : vector<2x8xf32>
    %59 = vector.extract_strided_slice %48 {offsets = [1, 0, 0], sizes = [1, 8, 32], strides = [1, 1, 1]} : vector<2x8x32xf32> to vector<1x8x32xf32>
    %60 = vector.shape_cast %59 : vector<1x8x32xf32> to vector<8x32xf32>
    %61 = vector.shape_cast %60 : vector<8x32xf32> to vector<1x8x32xf32>
    %62 = vector.broadcast %61 : vector<1x8x32xf32> to vector<2x8x32xf32>
    %63 = arith.mulf %46, %62 : vector<2x8x32xf32>
    %cst_37 = arith.constant dense<0.000000e+00> : vector<2x8xf32>
    %64 = vector.multi_reduction <add>, %63, %cst_37 [2] : vector<2x8x32xf32> to vector<2x8xf32>
    %65 = vector.extract_strided_slice %49 {offsets = [1, 0], sizes = [1, 8], strides = [1, 1]} : vector<2x8xf32> to vector<1x8xf32>
    %66 = vector.broadcast %65 : vector<1x8xf32> to vector<2x8xf32>
    %67 = arith.addf %64, %66 : vector<2x8xf32>
    %68 = vector.shape_cast %58 : vector<2x8xf32> to vector<2x1x8xf32>
    %c0_38 = arith.constant 0 : index
    %c0_39 = arith.constant 0 : index
    %c0_40 = arith.constant 0 : index
    %69 = vector.load %arg12[%c0_38, %c0_39, %c0_40] : memref<2x2x8xf32, #tpu.memory_space<vmem>>, vector<2x1x8xf32>
    tpu.vector_store %arg12[%c0_38, %c0_39, %c0_40], %68 {strides = array<i32>} : memref<2x2x8xf32, #tpu.memory_space<vmem>>, vector<2x1x8xf32>,
    %70 = vector.shape_cast %67 : vector<2x8xf32> to vector<2x1x8xf32>
    %c0_41 = arith.constant 0 : index
    %c1 = arith.constant 1 : index
    %c0_42 = arith.constant 0 : index
    %71 = vector.load %arg12[%c0_41, %c1, %c0_42] : memref<2x2x8xf32, #tpu.memory_space<vmem>>, vector<2x1x8xf32>
    tpu.vector_store %arg12[%c0_41, %c1, %c0_42], %70 {strides = array<i32>} : memref<2x2x8xf32, #tpu.memory_space<vmem>>, vector<2x1x8xf32>,
    return
  }
  func.func @transform_0(%arg0: i32) -> (i32, i32, i32) {
    %c0_i32 = arith.constant 0 : i32
    %c0_i32_0 = arith.constant 0 : i32
    %c0_i32_1 = arith.constant 0 : i32
    return %arg0, %c0_i32, %c0_i32_0 : i32, i32, i32
  }
  func.func @transform_1(%arg0: i32) -> (i32, i32, i32) {
    %c0_i32 = arith.constant 0 : i32
    %c0_i32_0 = arith.constant 0 : i32
    %c0_i32_1 = arith.constant 0 : i32
    return %arg0, %c0_i32, %c0_i32_0 : i32, i32, i32
  }
  func.func @transform_2(%arg0: i32) -> (i32, i32) {
    %c0_i32 = arith.constant 0 : i32
    %c0_i32_0 = arith.constant 0 : i32
    %c0_i32_1 = arith.constant 0 : i32
    return %c0_i32, %c0_i32_0 : i32, i32
  }
  func.func @transform_3(%arg0: i32) -> (i32, i32) {
    %c0_i32 = arith.constant 0 : i32
    %c0_i32_0 = arith.constant 0 : i32
    %c0_i32_1 = arith.constant 0 : i32
    return %c0_i32, %c0_i32_0 : i32, i32
  }
  func.func @transform_4(%arg0: i32) -> (i32, i32) {
    %c0_i32 = arith.constant 0 : i32
    %c0_i32_0 = arith.constant 0 : i32
    %c0_i32_1 = arith.constant 0 : i32
    return %c0_i32, %c0_i32_0 : i32, i32
  }
  func.func @transform_5(%arg0: i32) -> (i32, i32) {
    %c0_i32 = arith.constant 0 : i32
    %c0_i32_0 = arith.constant 0 : i32
    %c0_i32_1 = arith.constant 0 : i32
    return %c0_i32, %c0_i32_0 : i32, i32
  }
  func.func @transform_6(%arg0: i32) -> (i32, i32) {
    %c0_i32 = arith.constant 0 : i32
    %c0_i32_0 = arith.constant 0 : i32
    %c0_i32_1 = arith.constant 0 : i32
    return %c0_i32, %c0_i32_0 : i32, i32
  }
  func.func @transform_7(%arg0: i32) -> (i32, i32) {
    %c0_i32 = arith.constant 0 : i32
    %c0_i32_0 = arith.constant 0 : i32
    %c0_i32_1 = arith.constant 0 : i32
    return %c0_i32, %c0_i32_0 : i32, i32
  }
  func.func @transform_8(%arg0: i32) -> (i32, i32) {
    %c0_i32 = arith.constant 0 : i32
    %c0_i32_0 = arith.constant 0 : i32
    %c0_i32_1 = arith.constant 0 : i32
    return %c0_i32, %c0_i32_0 : i32, i32
  }
  func.func @transform_9(%arg0: i32) -> (i32, i32, i32) {
    %c0_i32 = arith.constant 0 : i32
    %c0_i32_0 = arith.constant 0 : i32
    %c0_i32_1 = arith.constant 0 : i32
    %c0_i32_2 = arith.constant 0 : i32
    return %c0_i32, %c0_i32_0, %c0_i32_1 : i32, i32, i32
  }
  func.func @transform_10(%arg0: i32) -> (i32, i32) {
    %c0_i32 = arith.constant 0 : i32
    %c0_i32_0 = arith.constant 0 : i32
    %c0_i32_1 = arith.constant 0 : i32
    return %c0_i32, %c0_i32_0 : i32, i32
  }
  func.func @transform_11(%arg0: i32) -> (i32, i32, i32) {
    %c0_i32 = arith.constant 0 : i32
    %c0_i32_0 = arith.constant 0 : i32
    %c0_i32_1 = arith.constant 0 : i32
    return %arg0, %c0_i32, %c0_i32_0 : i32, i32, i32
  }
  func.func @transform_12(%arg0: i32) -> (i32, i32, i32) {
    %c0_i32 = arith.constant 0 : i32
    %c0_i32_0 = arith.constant 0 : i32
    %c0_i32_1 = arith.constant 0 : i32
    return %arg0, %c0_i32, %c0_i32_0 : i32, i32, i32
  }
}

</mosaic_0001>

<bundles_post_ra>
// kernel: tpu_custom_call.1
= control target key start
LH: loop header
LB: loop body
LE: loop exit
PB: predicated region body
PF: predicated region fallthrough
CT: control target
= control target key end

     0   :  { %18 = vsyncpa [#allocation3], 0  ;;  %s1247_s0 = inlined_call_operand.vmem [shape: bf16[2,16,32], index: 0, kind: input, shape index: {}]   ;;  %s1248_s1 = inlined_call_operand.vmem [shape: s32[2,8,2], index: 1, kind: input, shape index: {}]   ;;  %s1249_s2 = inlined_call_operand.hbm [shape: bf16[16,16], index: 2, kind: input, shape index: {}]   ;;  %s1250_s3 = inlined_call_operand.hbm [shape: bf16[32,32], index: 3, kind: input, shape index: {}]   ;;  %s1251_s4 = inlined_call_operand.hbm [shape: f32[1,32], index: 4, kind: input, shape index: {}]   ;;  %s1252_s5 = inlined_call_operand.hbm [shape: bf16[32,32], index: 5, kind: input, shape index: {}]   ;;  %s1253_s6 = inlined_call_operand.hbm [shape: f32[1,32], index: 6, kind: input, shape index: {}]   ;;  %s1254_s7 = inlined_call_operand.vmem [shape: bf16[32,32], index: 7, kind: input, shape index: {}]   ;;  %s1255_s8 = inlined_call_operand.hbm [shape: f32[1,32], index: 8, kind: input, shape index: {}]   ;;  %s1256_s9 = inlined_call_operand.hbm [shape: f32[2,8,32], index: 9, kind: input, shape index: {}]   ;;  %s1257_s10 = inlined_call_operand.vmem [shape: f32[2,8], index: 10, kind: input, shape index: {}]   ;;  %s1258_s11 = inlined_call_operand.hbm [shape: f32[2,2,8], index: 11, kind: output, shape index: {0}]   ;;  %s1259_s12 = inlined_call_operand.hbm [shape: f32[2,8,32], index: 12, kind: output, shape index: {1}]  }
   0x1   :  { %19 = vsyncpa [#allocation6], 0 }
   0x2   :  { %20 = vsyncpa [#allocation9], 0 }
   0x3   :  { %21 = vsyncpa [#allocation12], 0 }
   0x4   :  { %22 = vsyncpa [#allocation4], 0 }
   0x5   :  { %23 = vsyncpa [#allocation16], 0  ;;  %s1048_s21 = smov [#allocation5]   ;;  %s1049_s23 = smov [#allocation8]  }
   0x6   :  { %s45_s22 = sshll.u32 %s1048_s21, 4  ;;  %s67_s24 = sshll.u32 %s1049_s23, 4  ;;  %s46_s22 = int_to_ptr.vmem [resolvable:$true] %s45_s22  ;;  %s68_s24 = int_to_ptr.vmem [resolvable:$true] %s67_s24 }
   0x7   :  { %s864_s25 = scalar_lea.vmem %s46_s22, 256  ;;  %p869_p1 = scmp.lt.s32.totalorder %s46_s22, %s46_s22 }
   0x8   :  { %p865_p0 = scmp.ne.s32.totalorder %s46_s22, %s864_s25  ;;  %p870_p2 = scmp.lt.s32.totalorder %s864_s25, %s864_s25 }
   0xa   :  { %p871_p3 = por %p870_p2, %p869_p1 }
   0xc   :  { %p872_p4 = pnand %p871_p3, %p865_p0 }
   0xe   :  { %875 = shalt.err (!%p872_p4)
}
   0xf   :  { %s1050_s26 = smov 64   ;;  %s1051_s27 = smov 4  }
  0x10   :  { %51 = dma.hbm_to_vmem [thread:$0]  %s1250_s3, 256, %s46_s22, [#allocation6], %s1050_s26, %s1050_s26, %s1051_s27  }
  0x11   :  { %s884_s30 = scalar_lea.vmem %s68_s24, 256  ;;  %p889_p6 = scmp.lt.s32.totalorder %s68_s24, %s68_s24 }
  0x12   :  { %p885_p5 = scmp.ne.s32.totalorder %s68_s24, %s884_s30  ;;  %p890_p7 = scmp.lt.s32.totalorder %s884_s30, %s884_s30 }
  0x14   :  { %p891_p8 = por %p890_p7, %p889_p6 }
  0x16   :  { %p892_p9 = pnand %p891_p8, %p885_p5 }
  0x18   :  { %895 = shalt.err (!%p892_p9)
}
  0x19   :  { %73 = dma.hbm_to_vmem [thread:$0]  %s1252_s5, 256, %s68_s24, [#allocation9], %s1050_s26, %s1050_s26, %s1051_s27  }
  0x1a   :  { %s1052_s15 = smov [#allocation11]   ;;  %s1053_s17 = smov [#allocation2]  }
  0x1b   :  { %s92_s16 = sshll.u32 %s1052_s15, 4  ;;  %s33_s18 = sshll.u32 %s1053_s17, 4  ;;  %s93_s16 = int_to_ptr.vmem [resolvable:$true] %s92_s16  ;;  %s34_s18 = int_to_ptr.vmem [resolvable:$true] %s33_s18 }
  0x1c   :  { %s904_s3 = scalar_lea.vmem %s93_s16, 16  ;;  %s908_s19 = scalar_lea.vmem %s93_s16, 32 }
  0x1d   :  { %p905_p10 = scmp.ne.s32.totalorder %s93_s16, %s904_s3  ;;  %p909_p11 = scmp.lt.s32.totalorder %s93_s16, %s93_s16 }
  0x1e   :  { %p910_p12 = scmp.lt.s32.totalorder %s908_s19, %s904_s3 }
  0x20   :  { %p911_p13 = por %p910_p12, %p909_p11 }
  0x22   :  { %p912_p0 = pnand %p911_p13, %p905_p10 }
  0x24   :  { %915 = shalt.err (!%p912_p0)
}
  0x25   :  { %95 = dma.hbm_to_vmem [thread:$0]  %s1255_s8, 16, %s93_s16, [#allocation12]  }
  0x26   :  { %s924_s22 = scalar_lea.vmem %s34_s18, 128  ;;  %p929_p2 = scmp.lt.s32.totalorder %s34_s18, %s34_s18 }
  0x27   :  { %p925_p1 = scmp.ne.s32.totalorder %s34_s18, %s924_s22  ;;  %p930_p3 = scmp.lt.s32.totalorder %s924_s22, %s924_s22 }
  0x29   :  { %p931_p4 = por %p930_p3, %p929_p2 }
  0x2b   :  { %p932_p5 = pnand %p931_p4, %p925_p1 }
  0x2d   :  { %935 = shalt.err (!%p932_p5)
}
  0x2e   :  { %39 = dma.hbm_to_vmem [thread:$0]  %s1249_s2, 128, %s34_s18, [#allocation3], %s1050_s26, %s1050_s26, %s1051_s27  }
  0x2f   :  { %s1054_s24 = smov [#allocation7]   ;;  %s1055_s28 = smov [#allocation10]  }
  0x30   :  { %s58_s25 = sshll.u32 %s1054_s24, 4  ;;  %s80_s29 = sshll.u32 %s1055_s28, 4  ;;  %s59_s25 = int_to_ptr.vmem [resolvable:$true] %s58_s25  ;;  %s81_s29 = int_to_ptr.vmem [resolvable:$true] %s80_s29 }
  0x31   :  { %s944_s8 = scalar_lea.vmem %s59_s25, 16  ;;  %s948_s30 = scalar_lea.vmem %s59_s25, 32 }
  0x32   :  { %p945_p6 = scmp.ne.s32.totalorder %s59_s25, %s944_s8  ;;  %p949_p7 = scmp.lt.s32.totalorder %s59_s25, %s59_s25 }
  0x33   :  { %p950_p8 = scmp.lt.s32.totalorder %s948_s30, %s944_s8 }
  0x35   :  { %p951_p9 = por %p950_p8, %p949_p7 }
  0x37   :  { %p952_p10 = pnand %p951_p9, %p945_p6 }
  0x39   :  { %955 = shalt.err (!%p952_p10)
}
  0x3a   :  { %61 = dma.hbm_to_vmem [thread:$0]  %s1251_s4, 16, %s59_s25, [#allocation6]  }
  0x3b   :  { %s964_s15 = scalar_lea.vmem %s81_s29, 16  ;;  %s968_s2 = scalar_lea.vmem %s81_s29, 32 }
  0x3c   :  { %p965_p11 = scmp.ne.s32.totalorder %s81_s29, %s964_s15  ;;  %p969_p12 = scmp.lt.s32.totalorder %s81_s29, %s81_s29 }
  0x3d   :  { %p970_p13 = scmp.lt.s32.totalorder %s968_s2, %s964_s15 }
  0x3f   :  { %p971_p0 = por %p970_p13, %p969_p12 }
  0x41   :  { %p972_p1 = pnand %p971_p0, %p965_p11 }
  0x43   :  { %975 = shalt.err (!%p972_p1)
}
  0x44   :  { %83 = dma.hbm_to_vmem [thread:$0]  %s1253_s6, 16, %s81_s29, [#allocation9]  }
  0x45   :  { %s1056_s16 = smov [#allocation13]  }
  0x46   :  { %s101_s17 = sshll.u32 %s1056_s16, 4  ;;  %s102_s17 = int_to_ptr.vmem [resolvable:$true] %s101_s17 }
  0x47   :  { %s984_s18 = scalar_lea.vmem %s102_s17, 256  ;;  %p989_p3 = scmp.lt.s32.totalorder %s102_s17, %s102_s17 }
  0x48   :  { %p985_p2 = scmp.ne.s32.totalorder %s102_s17, %s984_s18  ;;  %p990_p4 = scmp.lt.s32.totalorder %s984_s18, %s984_s18 }
  0x4a   :  { %p991_p5 = por %p990_p4, %p989_p3 }
  0x4c   :  { %p992_p6 = pnand %p991_p5, %p985_p2 }
  0x4e   :  { %995 = shalt.err (!%p992_p6)
}
  0x4f   :  { %s1057_s4 = smov 128   ;;  %s1058_s3 = smov 8  }
  0x50   :  { %107 = dma.hbm_to_vmem [thread:$0]  %s1256_s9, 256, %s102_s17, [#allocation12], %s1057_s4, %s1057_s4, %s1058_s3  }
  0x51   :  { %1036 = dma.done.wait [#allocation3], 128  }
  0x52   :  { %1037 = vsyncadd [#allocation3], 4294967168 }
  0x53   :  { %1038 = dma.done.wait [#allocation6], 272  }
  0x54   :  { %1039 = vsyncadd [#allocation6], 4294967024 }
  0x55   :  { %1040 = dma.done.wait [#allocation9], 272  }
  0x56   :  { %1041 = vsyncadd [#allocation9], 4294967024 }
  0x57   :  { %1042 = dma.done.wait [#allocation12], 272  }
  0x58   :  { %1043 = vsyncadd [#allocation12], 4294967024  ;;  %v1059_v0 = vmov 1   ;;  %v1060_v1 = vmov 0   ;;  %v1061_v2 = vmov 0.0   ;;  %v136_v3 = vld [vmem:[%s1248_s1] sm:$0xff]  ;;  %v138_v7 = vlaneseq }
  0x59   :  { %845 = vset.pattern.permute.xlu1 %v1059_v0  ;;  %844 = vset.pattern.permute.xlu0 %v1060_v1  ;;  %v137_v4 = vld [vmem:[%s1248_s1 + $0x8] sm:$0xff]  ;;  %v847_v5 = vld [vmem:[%s1247_s0] sm:$0xff]   ;;  %vm1062_vm0 = vmmov 0   ;;  %vm170_vm4 = vcmask 130048   ;;  %v849_v17 = vld [vmem:[#allocation5 + $0x8] sm:$0xff]   ;;  %vm282_vm8 = vcmask 261120  }
  0x5a   :  { %771 = vmatprep.subr.bf16.mxu0 %v1061_v2  ;;  %777 = vmatprep.subr.bf16.mxu1 %v1061_v2  ;;  %v848_v6 = vld [vmem:[%s1247_s0 + $0x8] sm:$0xff]   ;;  %v1186_v8 = vand.u32 127, %v138_v7  ;;  %v851_v33 = vld [vmem:[#allocation2] sm:$0xff]   ;;  %v739_v36 = vld [vmem:[#allocation7] ss:$0 sm:$0xff]  ;;  %s1063_s30 = smov [#allocation15]  }
  0x5b   :  { %149 = vperm.xlu1 %845, %v136_v3   ;;  %141 = vperm.xlu0 %844, %v136_v3   ;;  %v850_v18 = vld [vmem:[#allocation5] sm:$0xff]   ;;  %v853_v35 = vld [vmem:[#allocation8] sm:$0xff]   ;;  %s711_s13 = sshll.u32 %s1063_s30, 4  ;;  %s712_s13 = int_to_ptr.vmem [resolvable:$true] %s711_s13 }
  0x5c   :  { %773 = vmatprep.mubr.msk.bf16.mxu0 %vm1062_vm0, %v1061_v2  ;;  %779 = vmatprep.mubr.msk.bf16.mxu1 %vm1062_vm0, %v1061_v2  ;;  %v852_v34 = vld [vmem:[#allocation8 + $0x8] sm:$0xff]   ;;  %v745_v53 = vld [vmem:[#allocation10] ss:$0 sm:$0xff]  ;;  %p1001_p8 = scmp.lt.s32.totalorder %s712_s13, %s712_s13 }
  0x5d   :  { %772 = vmatpush3.bf16.msra.mxu0 %v847_v5  ;;  %778 = vmatpush3.bf16.msra.mxu1 %v848_v6  ;;  %v854_v51 = vld [vmem:[%s1254_s7 + $0x8] sm:$0xff]   ;;  %v855_v52 = vld [vmem:[%s1254_s7] sm:$0xff]  }
  0x5e   :  { %783 = vmatprep.subr.bf16.mxu0 %v1061_v2  ;;  %791 = vmatprep.subr.bf16.mxu1 %v1061_v2 }
  0x5f   :  { %152 = vperm.xlu1 %845, %v137_v4   ;;  %144 = vperm.xlu0 %844, %v137_v4   ;;  %v750_v4 = vld [vmem:[#allocation11] ss:$0 sm:$0xff] }
  0x63   :  { %846 = vset.pattern.permute.xlu1 %v1060_v1 }
  0xd6   :  { %v150_v9 = vpop.permute.xlu1 %149  ;;  %v142_v10 = vpop.permute.xlu0 %141 }
  0xd7   :  { %vm154_vm1 = vcmp.le.s32.totalorder %v1186_v8, %v150_v9  ;;  %vm146_vm2 = vcmp.ge.s32.totalorder %v1186_v8, %v142_v10  ;;  %v612_v10 = vld [vmem:[#allocation13] sm:$0xff] }
  0xd8   :  { %vm156_vm3 = vmand %vm146_vm2, %vm154_vm1 }
  0xd9   :  { %v730_v11 = vsel %vm156_vm3, 1.0, %v1061_v2 }
  0xda   :  { %v162_v12 = vpack.c.bf16 %v730_v11, %v730_v11  ;;  %v153_v13 = vpop.permute.xlu1 %152  ;;  %v145_v14 = vpop.permute.xlu0 %144 }
  0xdb   :  { %vm155_vm5 = vcmp.le.s32.totalorder %v1186_v8, %v153_v13  ;;  %vm147_vm6 = vcmp.ge.s32.totalorder %v1186_v8, %v145_v14  ;;  %v613_v13 = vld [vmem:[#allocation13 + $0x8] sm:$0xff] }
  0xdc   :  { %vm157_vm7 = vmand %vm147_vm6, %vm155_vm5  ;;  %774 = vmatmul.mubr.msk.bf16.vlgmr.msra.gmra.mxu0 %vm170_vm4, %v162_v12 }
  0xdd   :  { %v731_v15 = vsel %vm157_vm7, 1.0, %v1061_v2  ;;  %787 = vmatprep.mubr.msk.bf16.mxu0 %vm1062_vm0, %v1061_v2  ;;  %784 = vmatpush3.bf16.msra.mxu0 %v849_v17 }
  0xde   :  { %v163_v16 = vpack.c.bf16 %v731_v15, %v731_v15  ;;  %785 = vmatprep.subr.bf16.mxu0 %v1061_v2 }
  0xe0   :  { %780 = vmatmul.mubr.msk.bf16.vlgmr.msra.gmra.mxu1 %vm170_vm4, %v163_v16 }
  0xe1   :  { %793 = vmatprep.mubr.msk.bf16.mxu1 %vm1062_vm0, %v1061_v2  ;;  %786 = vmatpush3.bf16.msra.mxu0 %v850_v18 }
  0xe2   :  { %797 = vmatprep.subr.bf16.mxu0 %v1061_v2 }
 0x19c   :  { %v208_v19 = vpop.f32.mrf.mxu0 }
 0x19e   :  { %v775_v20 = vpop.f32.mrf.mxu0 }
 0x1a0   :  { %v211_v21 = vpop.f32.mrf.mxu0  ;;  %v257_v22 = vpop.f32.mrf.mxu1 }
 0x1a1   :  { %v265_v23 = vpack.c.bf16 %v257_v22, %v208_v19 }
 0x1a2   :  { %v776_v24 = vpop.f32.mrf.mxu0  ;;  %v781_v25 = vpop.f32.mrf.mxu1 }
 0x1a3   :  { %788 = vmatmul.mubr.msk.bf16.vlgmr.msra.gmra.mxu0 %vm282_vm8, %v265_v23  ;;  %v624_v25 = vshrl.u32 %v138_v7, 7 }
 0x1a4   :  { %v260_v26 = vpop.f32.mrf.mxu1  ;;  %801 = vmatprep.mubr.msk.bf16.mxu0 %vm1062_vm0, %v1061_v2  ;;  %798 = vmatpush3.bf16.msra.mxu0 %v852_v34 }
 0x1a5   :  { %799 = vmatprep.subr.bf16.mxu0 %v1061_v2  ;;  %v625_v26 = vsub.s32 0, %v624_v25 }
 0x1a6   :  { %v782_v27 = vpop.f32.mrf.mxu1 }
 0x1a7   :  { %v614_v27 = vld [vmem:[%s1257_s10] sm:$0x3]  ;;  %s996_s10 = scalar_lea.vmem %s712_s13, 256 }
 0x1a8   :  { %800 = vmatpush3.bf16.msra.mxu0 %v853_v35  ;;  %p997_p7 = scmp.ne.s32.totalorder %s712_s13, %s996_s10  ;;  %p1002_p9 = scmp.lt.s32.totalorder %s996_s10, %s996_s10 }
 0x1a9   :  { %811 = vmatprep.subr.bf16.mxu0 %v1061_v2 }
 0x1aa   :  { %p1003_p10 = por %p1002_p9, %p1001_p8 }
 0x1ac   :  { %p1004_p11 = pnand %p1003_p10, %p997_p7 }
 0x263   :  { %v320_v28 = vpop.f32.mrf.mxu0 }
 0x265   :  { %v789_v29 = vpop.f32.mrf.mxu0 }
 0x266   :  { %v644_v29 = vsub.s32 1, %v624_v25 }
 0x267   :  { %v323_v30 = vpop.f32.mrf.mxu0 }
 0x268   :  { %v327_v31 = vpack.c.bf16 %v323_v30, %v320_v28  ;;  %v626_v28 = vrot.slane %v614_v27, %v625_v26  ;;  %v645_v30 = vrot.slane %v614_v27, %v644_v29 }
 0x269   :  { %v790_v32 = vpop.f32.mrf.mxu0 }
 0x26a   :  { %792 = vmatpush3.bf16.msra.mxu1 %v327_v31 }
 0x26b   :  { %805 = vmatprep.subr.bf16.mxu1 %v1061_v2 }
 0x26d   :  { %794 = vmatmul.mubr.msk.bf16.vlgmr.msra.gmra.mxu1 %vm170_vm4, %v851_v33 }
 0x26e   :  { %807 = vmatprep.mubr.msk.bf16.mxu1 %vm1062_vm0, %v1061_v2 }
 0x32d   :  { %v377_v37 = vpop.f32.mrf.mxu1 }
 0x32e   :  { %v378_v39 = vadd.f32 %v739_v36, %v377_v37 }
 0x32f   :  { %v795_v38 = vpop.f32.mrf.mxu1 }
 0x330   :  { %v384_v43 = vmax.f32 %v378_v39, 0.0 }
 0x331   :  { %v380_v40 = vpop.f32.mrf.mxu1 }
 0x332   :  { %v381_v41 = vadd.f32 %v739_v36, %v380_v40 }
 0x333   :  { %v796_v42 = vpop.f32.mrf.mxu1 }
 0x334   :  { %v385_v44 = vmax.f32 %v381_v41, 0.0 }
 0x336   :  { %v386_v45 = vpack.c.bf16 %v385_v44, %v384_v43 }
 0x338   :  { %802 = vmatmul.mubr.msk.bf16.vlgmr.msra.gmra.mxu0 %vm282_vm8, %v386_v45 }
 0x339   :  { %815 = vmatprep.mubr.msk.bf16.mxu0 %vm1062_vm0, %v1061_v2  ;;  %812 = vmatpush3.bf16.msra.mxu0 %v854_v51 }
 0x33a   :  { %813 = vmatprep.subr.bf16.mxu0 %v1061_v2 }
 0x33d   :  { %814 = vmatpush3.bf16.msra.mxu0 %v855_v52 }
 0x3f8   :  { %v440_v46 = vpop.f32.mrf.mxu0 }
 0x3fa   :  { %v803_v47 = vpop.f32.mrf.mxu0 }
 0x3fc   :  { %v443_v48 = vpop.f32.mrf.mxu0 }
 0x3fd   :  { %v447_v49 = vpack.c.bf16 %v443_v48, %v440_v46 }
 0x3fe   :  { %v804_v50 = vpop.f32.mrf.mxu0 }
 0x3ff   :  { %806 = vmatpush3.bf16.msra.mxu1 %v447_v49 }
 0x400   :  { %819 = vmatprep.subr.bf16.mxu1 %v1061_v2 }
 0x402   :  { %808 = vmatmul.mubr.msk.bf16.vlgmr.msra.gmra.mxu1 %vm170_vm4, %v851_v33 }
 0x403   :  { %821 = vmatprep.mubr.msk.bf16.mxu1 %vm1062_vm0, %v1061_v2 }
 0x4c2   :  { %v489_v54 = vpop.f32.mrf.mxu1 }
 0x4c3   :  { %v490_v56 = vadd.f32 %v745_v53, %v489_v54 }
 0x4c4   :  { %v809_v55 = vpop.f32.mrf.mxu1 }
 0x4c5   :  { %v496_v60 = vmax.f32 %v490_v56, 0.0 }
 0x4c6   :  { %v492_v57 = vpop.f32.mrf.mxu1 }
 0x4c7   :  { %v493_v58 = vadd.f32 %v745_v53, %v492_v57 }
 0x4c8   :  { %v810_v59 = vpop.f32.mrf.mxu1 }
 0x4c9   :  { %v497_v61 = vmax.f32 %v493_v58, 0.0 }
 0x4cb   :  { %v498_v62 = vpack.c.bf16 %v497_v61, %v496_v60 }
 0x4cd   :  { %816 = vmatmul.mubr.msk.bf16.vlgmr.msra.gmra.mxu0 %vm282_vm8, %v498_v62 }
 0x58d   :  { %v552_v63 = vpop.f32.mrf.mxu0 }
 0x58f   :  { %v817_v0 = vpop.f32.mrf.mxu0 }
 0x591   :  { %v555_v1 = vpop.f32.mrf.mxu0 }
 0x592   :  { %v559_v2 = vpack.c.bf16 %v555_v1, %v552_v63 }
 0x593   :  { %v818_v3 = vpop.f32.mrf.mxu0 }
 0x594   :  { %820 = vmatpush3.bf16.msra.mxu1 %v559_v2 }
 0x597   :  { %822 = vmatmul.mubr.msk.bf16.vlgmr.msra.gmra.mxu1 %vm170_vm4, %v851_v33 }
 0x657   :  { %v601_v5 = vpop.f32.mrf.mxu1 }
 0x658   :  { %v602_v6 = vadd.f32 %v750_v4, %v601_v5 }
 0x659   :  { %v823_v9 = vpop.f32.mrf.mxu1 }
 0x65a   :  { %v608_v11 = vmax.f32 %v602_v6, 0.0 }
 0x65b   :  { %v604_v12 = vpop.f32.mrf.mxu1 }
 0x65c   :  { %610 = vst.msk [vmem:[#allocation15] sm:$0xff] %vm282_vm8, %v608_v11  ;;  %v605_v14 = vadd.f32 %v750_v4, %v604_v12  ;;  %v615_v15 = vmul.f32 %v612_v10, %v608_v11  ;;  %v634_v19 = vmul.f32 %v613_v13, %v608_v11 }
 0x65d   :  { %v824_v16 = vpop.f32.mrf.mxu1 }
 0x65e   :  { %v609_v17 = vmax.f32 %v605_v14, 0.0  ;;  %v617_v18 = vsel %vm282_vm8, %v615_v15, 0.0  ;;  %v636_v21 = vsel %vm282_vm8, %v634_v19, 0.0 }
 0x65f   :  { %618 = vadd.xlane.f32.xlu0 %v617_v18 }
 0x660   :  { %611 = vst.msk [vmem:[#allocation15 + $0x8] sm:$0xff] %vm282_vm8, %v609_v17  ;;  %v616_v20 = vmul.f32 %v612_v10, %v609_v17  ;;  %v635_v23 = vmul.f32 %v613_v13, %v609_v17 }
 0x662   :  { %v620_v22 = vsel %vm282_vm8, %v616_v20, 0.0  ;;  %v639_v24 = vsel %vm282_vm8, %v635_v23, 0.0 }
 0x663   :  { %637 = vadd.xlane.f32.xlu0 %v636_v21  ;;  %621 = vadd.xlane.f32.xlu1 %v620_v22 }
 0x667   :  { %640 = vadd.xlane.f32.xlu0 %v639_v24 }
 0x674   :  { %629 = vbcast.lane.b32.xlu1 %v626_v28, 256 }
 0x67d   :  { %648 = vbcast.lane.b32.xlu0 %v645_v30, 256 }
 0x6e8   :  { %v619_v31 = vpop.xlane.xlu0 %618 }
 0x6ec   :  { %v638_v32 = vpop.xlane.xlu0 %637  ;;  %v622_v33 = vpop.xlane.xlu1 %621 }
 0x6f0   :  { %v641_v34 = vpop.xlane.xlu0 %640  ;;  %v630_v35 = vpop.permute.xlu1 %629 }
 0x6f1   :  { %v632_v36 = vadd.f32 %v630_v35, %v619_v31  ;;  %v633_v38 = vadd.f32 %v630_v35, %v622_v33 }
 0x6f3   :  { %656 = vperm.xlu1 %846, %v632_v36  }
 0x6f4   :  { %v649_v37 = vpop.permute.xlu0 %648 }
 0x6f5   :  { %v651_v7 = vadd.f32 %v649_v37, %v638_v32  ;;  %v652_v39 = vadd.f32 %v649_v37, %v641_v34 }
 0x6f7   :  { %677 = vperm.xlu0 %844, %v651_v7   ;;  %659 = vperm.xlu1 %846, %v633_v38  }
 0x6fb   :  { %680 = vperm.xlu1 %846, %v652_v39  }
 0x6fc   :  { %1007 = shalt.err (!%p1004_p11)
}
 0x6fd   :  { %717 = dma.vmem_to_hbm [thread:$0]  %s712_s13, 256, %s1259_s12, [#allocation16], %s1057_s4, %s1057_s4, %s1058_s3   ;;  %v663_v40 = vsub.s32 %v1186_v8, %v624_v25  ;;  %vm671_vm9 = vcmask 57344  }
 0x6fe   :  { %s1064_s2 = smov [#allocation14]  }
 0x6ff   :  { %s699_s26 = sshll.u32 %s1064_s2, 4  ;;  %s700_s26 = int_to_ptr.vmem [resolvable:$true] %s699_s26 }
 0x700   :  { %s1016_s27 = scalar_lea.vmem %s700_s26, 64  ;;  %p1021_p13 = scmp.lt.s32.totalorder %s700_s26, %s700_s26 }
 0x701   :  { %p1017_p12 = scmp.ne.s32.totalorder %s700_s26, %s1016_s27  ;;  %p1022_p0 = scmp.lt.s32.totalorder %s1016_s27, %s1016_s27 }
 0x703   :  { %p1023_p1 = por %p1022_p0, %p1021_p13 }
 0x705   :  { %p1024_p2 = pnand %p1023_p1, %p1017_p12 }
 0x76e   :  { %v657_v41 = vpop.permute.xlu1 %656 }
 0x76f   :  { %v664_v42 = vrot.slane %v657_v41, %v663_v40 }
 0x771   :  { %672 = vst.msk [vmem:[#allocation14] sm:$0x1] %vm671_vm9, %v664_v42 }
 0x772   :  { %v678_v43 = vpop.permute.xlu0 %677  ;;  %v660_v44 = vpop.permute.xlu1 %659 }
 0x773   :  { %v685_v45 = vrot.slane %v678_v43, %v663_v40  ;;  %v668_v46 = vrot.slane %v660_v44, %v663_v40 }
 0x775   :  { %692 = vst.msk [vmem:[#allocation14 + $0x1] sm:$0x1] %vm671_vm9, %v685_v45  ;;  %673 = vst.msk [vmem:[#allocation14 + $0x2] sm:$0x1] %vm671_vm9, %v668_v46 }
 0x776   :  { %v681_v47 = vpop.permute.xlu1 %680 }
 0x777   :  { %v689_v48 = vrot.slane %v681_v47, %v663_v40 }
 0x779   :  { %693 = vst.msk [vmem:[#allocation14 + $0x3] sm:$0x1] %vm671_vm9, %v689_v48 }
 0x77a   :  { %1027 = shalt.err (!%p1024_p2)
}
 0x77b   :  { %s1065_s12 = smov 32   ;;  %s1066_s16 = smov 2  }
 0x77c   :  { %705 = dma.vmem_to_hbm [thread:$0]  %s700_s26, 64, %s1258_s11, [#allocation4], %s1065_s12, %s1065_s12, %s1066_s16  }
 0x77d   :  { %1044 = dma.done.wait [#allocation4], 64  }
 0x77e   :  { %1045 = vsyncadd [#allocation4], 4294967232 }
 0x77f   :  { %1046 = dma.done.wait [#allocation16], 256  }
 0x780   :  { %1047 = vsyncadd [#allocation16], 4294967040 }
 0x781   :  { %724 = vsyncpa [#allocation3], 1 }
 0x782   :  { %725 = vsyncpa [#allocation6], 1 }
 0x783   :  { %726 = vsyncpa [#allocation9], 1 }
 0x784   :  { %727 = vsyncpa [#allocation12], 1 }
 0x785   :  { %728 = vsyncpa [#allocation4], 1 }
 0x786   :  { %729 = vsyncpa [#allocation16], 1 }

</bundles_post_ra>
